<compile_context>
chip_gen: v6e
topology: v6e:2x2x1
jax: 0.10.0
libtpu: 0.0.40
codegen_flags: <defaults>
</compile_context>

<pallas_src>
import functools

import jax
import jax.numpy as jnp
from jax.experimental import pallas as pl
from jax.experimental.pallas import tpu as pltpu

_BN_EPS = 1e-5
_INV_SQRT2 = 0.7071067811865476
_LANE = 128


def _round_up(n, m):
    return ((n + m - 1) // m) * m


def _vmem_capacity_bytes():
    """Per-chip VMEM capacity; falls back to the most restrictive generation (v7x, 64 MiB/TC)."""
    try:
        return int(pltpu.get_tpu_info().vmem_capacity_bytes)
    except Exception:
        return 64 * 1024 * 1024


def _gelu_exact(x):
    # torch.nn.GELU default: 0.5 * x * (1 + erf(x / sqrt(2)))
    # TODO(synk): tanh-approx GELU would halve EUP pushes once batch-tiled, but
    # breaks the 1e-4 parity budget, so the exact form is kept.
    return 0.5 * x * (1.0 + jax.lax.erf(x * _INV_SQRT2))


def _softplus(x):
    # torch.nn.Softplus(beta=1, threshold=20)
    return jnp.where(x > 20.0, x, jnp.log1p(jnp.exp(jnp.minimum(x, 20.0))))


def shared_qz_kernel(hp, op, x_ref, w1_ref, w2_ref, wh_ref, slab_ref, out_ref):
    """Fully-VMEM-resident forward pass.

    slab_ref rows: 0/1 = gamma1/beta1 (width hp), 2/3 = gamma2/beta2 (width op),
    4 = fused head bias (width op), 5 = softplus lane mask (width op).
    """
    mm = w1_ref.dtype  # matmul operand dtype (f32 or bf16); accumulation is f32.

    def bn_gelu(h, gamma, beta):
        # BatchNorm1d (batch stats, biased variance) with numerically-safe
        # two-pass variance, fused into one scale/shift, followed by exact GELU.
        # Zero-padded feature columns (gamma = beta = 0) stay exactly zero.
        inv_n = 1.0 / h.shape[0]
        mean = jnp.sum(h, axis=0, keepdims=True) * inv_n
        d = h - mean
        var = jnp.sum(d * d, axis=0, keepdims=True) * inv_n
        scale = gamma * jax.lax.rsqrt(var + _BN_EPS)
        return _gelu_exact(d * scale + beta)

    # Block 0: Linear -> BN -> GELU.  (Linear bias dropped: cancelled by the
    # BN batch-mean subtraction.)
    h = jnp.dot(x_ref[...], w1_ref[...], preferred_element_type=jnp.float32)
    h = bn_gelu(h, slab_ref[0:1, :hp], slab_ref[1:2, :hp])

    # Block 1 (final): Linear -> BN -> GELU, lane-padded to `op` columns
    # (padded columns have zero weight/gamma/beta and remain exactly 0).
    h = jnp.dot(h.astype(mm), w2_ref[...], preferred_element_type=jnp.float32)
    h = bn_gelu(h, slab_ref[2:3, :op], slab_ref[3:4, :op])

    # Fused heads: one matmul; lanes [0,out) = z_loc, [out,2*out) = z_sca,
    # remaining padded lanes are zero and sliced away by the wrapper.
    z = jnp.dot(h.astype(mm), wh_ref[...], preferred_element_type=jnp.float32)
    z = z + slab_ref[4:5, :op]
    sp = _softplus(z)
    out_ref[...] = jnp.where(slab_ref[5:6, :op] != 0.0, sp, z)


def pack_params(p, mm_dtype=jnp.float32):
    """Fuse / lane-pad the torch-style parameters for the kernel (done once).

    mm_dtype controls the matmul operand precision (weights cast here, x at
    call time); bf16 is the production setting, f32 preserves 1e-4 parity.
    """
    in_dim, hidden = p["w1"].shape
    out_dim = p["w_loc"].shape[1]
    hp = _round_up(hidden, _LANE)
    op = _round_up(2 * out_dim, _LANE)
    lanes = max(hp, op)

    # Matmul weights (biases b1/b2 dropped: cancelled by BN batch-mean).
    w1 = jnp.zeros((in_dim, hp), jnp.float32).at[:, :hidden].set(p["w1"])
    w2 = jnp.zeros((hp, op), jnp.float32).at[:hidden, :out_dim].set(p["w2"])
    wh = (jnp.zeros((op, op), jnp.float32)
          .at[:out_dim, :out_dim].set(p["w_loc"])
          .at[:out_dim, out_dim:2 * out_dim].set(p["w_sca"]))
    w1, w2, wh = (w.astype(mm_dtype) for w in (w1, w2, wh))

    # Single (8, lanes) parameter slab: BN affines, head bias, softplus mask.
    slab = jnp.zeros((8, lanes), jnp.float32)
    slab = slab.at[0, :hidden].set(p["g1"][0])
    slab = slab.at[1, :hidden].set(p["be1"][0])
    slab = slab.at[2, :out_dim].set(p["g2"][0])
    slab = slab.at[3, :out_dim].set(p["be2"][0])
    slab = slab.at[4, :out_dim].set(p["b_loc"][0])
    slab = slab.at[4, out_dim:2 * out_dim].set(p["b_sca"][0])
    slab = slab.at[5, out_dim:2 * out_dim].set(1.0)   # softplus lane mask

    return dict(w1=w1, w2=w2, wh=wh, slab=slab,
                in_dim=in_dim, hidden_pad=hp, out_dim=out_dim, out_pad=op,
                mm_dtype=mm_dtype)


def shared_qz_forward(x, packed):
    B = x.shape[0]
    in_dim = packed["in_dim"]
    hp, op = packed["hidden_pad"], packed["out_pad"]
    out_dim = packed["out_dim"]
    mm_dtype = packed["mm_dtype"]

    x = x.astype(mm_dtype)
    args = (x, packed["w1"], packed["w2"], packed["wh"], packed["slab"])

    # Fully-VMEM-resident plan sized against the per-chip budget (explicit
    # vmem_limit_bytes rather than relying on the scoped default, which is
    # only 16 MiB on v5e).  Larger B / hidden_dim => batch-tiled grid with a
    # two-pass BatchNorm (see TODO at top of file).
    vmem_bytes = sum(int(a.size) * a.dtype.itemsize for a in args) + B * op * 4
    vmem_limit = int(min(_vmem_capacity_bytes() // 2, 32 * 1024 * 1024))
    assert vmem_bytes <= vmem_limit, (
        "fully-resident single-call plan exceeds the per-chip VMEM budget; "
        "switch to a batch-tiled grid with two-pass BatchNorm")

    # Advisory cost hint for XLA's scheduler around this tiny custom call.
    flops = 2 * B * (in_dim * hp + hp * op + op * op)
    transcendentals = B * (hp + 3 * op) + 2 * (hp + op)  # erf x2, softplus, rsqrt
    cost = pl.CostEstimate(flops=int(flops),
                           transcendentals=int(transcendentals),
                           bytes_accessed=int(vmem_bytes))

    vmem = lambda: pl.BlockSpec(memory_space=pltpu.MemorySpace.VMEM)
    out = pl.pallas_call(
        functools.partial(shared_qz_kernel, hp, op),
        out_shape=jax.ShapeDtypeStruct((B, op), jnp.float32),
        in_specs=[vmem() for _ in args],
        out_specs=vmem(),
        compiler_params=pltpu.CompilerParams(vmem_limit_bytes=vmem_limit),
        cost_estimate=cost,
    )(*args)

    z_mu = out[:, :out_dim]
    z_sca = out[:, out_dim:2 * out_dim]
    return z_mu, z_sca


def init_params(key, in_dim, out_dim, hidden_dim):
    """Deterministic init mimicking nn.Linear default (uniform +-1/sqrt(fan_in))."""
    def lin(k, din, dout):
        k1, k2 = jax.random.split(k)
        bound = 1.0 / (din ** 0.5)
        w = jax.random.uniform(k1, (din, dout), jnp.float32, -bound, bound)
        b = jax.random.uniform(k2, (1, dout), jnp.float32, -bound, bound)
        return w, b

    ks = jax.random.split(key, 4)
    w1, b1 = lin(ks[0], in_dim, hidden_dim)
    w2, b2 = lin(ks[1], hidden_dim, out_dim)
    wl, bl = lin(ks[2], out_dim, out_dim)
    ws, bs = lin(ks[3], out_dim, out_dim)
    return dict(
        w1=w1, b1=b1,
        g1=jnp.ones((1, hidden_dim), jnp.float32),
        be1=jnp.zeros((1, hidden_dim), jnp.float32),
        w2=w2, b2=b2,
        g2=jnp.ones((1, out_dim), jnp.float32),
        be2=jnp.zeros((1, out_dim), jnp.float32),
        w_loc=wl, b_loc=bl,
        w_sca=ws, b_sca=bs,
    )


def _reference_forward(x, p):
    """Pure-JAX, torch-faithful f32 reference (biases kept, two-pass BN, split heads)."""
    def bn(h, g, b):
        mean = jnp.mean(h, axis=0, keepdims=True)
        var = jnp.mean(jnp.square(h - mean), axis=0, keepdims=True)
        return (h - mean) * jax.lax.rsqrt(var + _BN_EPS) * g + b

    h = x @ p["w1"] + p["b1"]
    h = _gelu_exact(bn(h, p["g1"], p["be1"]))
    h = h @ p["w2"] + p["b2"]
    h = _gelu_exact(bn(h, p["g2"], p["be2"]))
    mu = h @ p["w_loc"] + p["b_loc"]
    sca = _softplus(h @ p["w_sca"] + p["b_sca"])
    return mu, sca


if __name__ == "__main__":
    B, IN_DIM, OUT_DIM, HIDDEN = 8, 32, 16, 128  # small shapes; hidden_dim=[128]

    key = jax.random.PRNGKey(0)
    kx, kp = jax.random.split(key)
    x = jax.random.normal(kx, (B, IN_DIM), jnp.float32)
    params = init_params(kp, IN_DIM, OUT_DIM, HIDDEN)
    ref_mu, ref_sca = _reference_forward(x, params)

    # f32 operand path: tight (1e-4) parity with the torch-faithful reference.
    packed_f32 = pack_params(params, jnp.float32)
    mu32, sca32 = shared_qz_forward(x, packed_f32)
    jax.block_until_ready((mu32, sca32))
    assert mu32.shape == (B, OUT_DIM) and sca32.shape == (B, OUT_DIM)
    assert jnp.allclose(mu32, ref_mu, atol=1e-4, rtol=1e-4)
    assert jnp.allclose(sca32, ref_sca, atol=1e-4, rtol=1e-4)
    assert bool(jnp.all(sca32 > 0.0))  # softplus output must be positive

    # bf16 operand path (f32 accumulate): the production configuration, checked
    # against the f32 reference with a bf16-sized tolerance.
    packed_bf16 = pack_params(params, jnp.bfloat16)
    mu16, sca16 = shared_qz_forward(x, packed_bf16)
    jax.block_until_ready((mu16, sca16))
    assert mu16.shape == (B, OUT_DIM) and sca16.shape == (B, OUT_DIM)
    assert jnp.allclose(mu16, ref_mu, atol=2e-1, rtol=1e-1)
    assert jnp.allclose(sca16, ref_sca, atol=2e-1, rtol=1e-1)
    assert bool(jnp.all(sca16 > 0.0))

    print("KERNEL_OK")
</pallas_src>

<mosaic_0001>
module attributes {stable_mosaic.version = 11 : i64} {
  func.func @shared_qz_kernel(%arg0: memref<8x32xf32, #tpu.memory_space<vmem>>, %arg1: memref<32x128xf32, #tpu.memory_space<vmem>>, %arg2: memref<128x128xf32, #tpu.memory_space<vmem>>, %arg3: memref<128x128xf32, #tpu.memory_space<vmem>>, %arg4: memref<8x128xf32, #tpu.memory_space<vmem>>, %arg5: memref<8x128xf32, #tpu.memory_space<vmem>>) attributes {dimension_semantics = [], scalar_prefetch = 0 : i64, scratch_operands = 0 : i64, tpu.core_type = #tpu.core_type<tc>} {
    %c0 = arith.constant 0 : index
    %c0_0 = arith.constant 0 : index
    %0 = vector.load %arg0[%c0, %c0_0] : memref<8x32xf32, #tpu.memory_space<vmem>>, vector<8x32xf32>
    %c0_1 = arith.constant 0 : index
    %c0_2 = arith.constant 0 : index
    %1 = vector.load %arg1[%c0_1, %c0_2] : memref<32x128xf32, #tpu.memory_space<vmem>>, vector<32x128xf32>
    %cst = arith.constant dense<0.000000e+00> : vector<8x128xf32>
    %2 = tpu.matmul %0, %1, %cst {dimension_numbers = #tpu.dot_dimension_numbers<[1], [0], [0], [1], [0, 0, 1, 1], [], []>} : vector<8x32xf32>, vector<32x128xf32>, vector<8x128xf32> -> vector<8x128xf32>
    %c0_3 = arith.constant 0 : index
    %c0_4 = arith.constant 0 : index
    %3 = vector.load %arg4[%c0_3, %c0_4] : memref<8x128xf32, #tpu.memory_space<vmem>>, vector<1x128xf32>
    %c1 = arith.constant 1 : index
    %c0_5 = arith.constant 0 : index
    %4 = vector.load %arg4[%c1, %c0_5] : memref<8x128xf32, #tpu.memory_space<vmem>>, vector<1x128xf32>
    %cst_6 = arith.constant dense<0.000000e+00> : vector<128xf32>
    %5 = vector.multi_reduction <add>, %2, %cst_6 [0] : vector<8x128xf32> to vector<128xf32>
    %6 = vector.shape_cast %5 : vector<128xf32> to vector<1x128xf32>
    %cst_7 = arith.constant 1.250000e-01 : f32
    %7 = vector.broadcast %cst_7 : f32 to vector<1x128xf32>
    %8 = arith.mulf %6, %7 : vector<1x128xf32>
    %9 = vector.broadcast %8 : vector<1x128xf32> to vector<8x128xf32>
    %10 = arith.subf %2, %9 : vector<8x128xf32>
    %11 = arith.mulf %10, %10 : vector<8x128xf32>
    %cst_8 = arith.constant dense<0.000000e+00> : vector<128xf32>
    %12 = vector.multi_reduction <add>, %11, %cst_8 [0] : vector<8x128xf32> to vector<128xf32>
    %13 = vector.shape_cast %12 : vector<128xf32> to vector<1x128xf32>
    %cst_9 = arith.constant 1.250000e-01 : f32
    %14 = vector.broadcast %cst_9 : f32 to vector<1x128xf32>
    %15 = arith.mulf %13, %14 : vector<1x128xf32>
    %cst_10 = arith.constant 9.99999974E-6 : f32
    %16 = vector.broadcast %cst_10 : f32 to vector<1x128xf32>
    %17 = arith.addf %15, %16 : vector<1x128xf32>
    %18 = math.rsqrt %17 : vector<1x128xf32>
    %19 = arith.mulf %3, %18 : vector<1x128xf32>
    %20 = vector.broadcast %19 : vector<1x128xf32> to vector<8x128xf32>
    %21 = arith.mulf %10, %20 : vector<8x128xf32>
    %22 = vector.broadcast %4 : vector<1x128xf32> to vector<8x128xf32>
    %23 = arith.addf %21, %22 : vector<8x128xf32>
    %cst_11 = arith.constant 5.000000e-01 : f32
    %24 = vector.broadcast %cst_11 : f32 to vector<8x128xf32>
    %25 = arith.mulf %24, %23 : vector<8x128xf32>
    %cst_12 = arith.constant 0.707106769 : f32
    %26 = vector.broadcast %cst_12 : f32 to vector<8x128xf32>
    %27 = arith.mulf %23, %26 : vector<8x128xf32>
    %28 = math.erf %27 : vector<8x128xf32>
    %cst_13 = arith.constant 1.000000e+00 : f32
    %29 = vector.broadcast %cst_13 : f32 to vector<8x128xf32>
    %30 = arith.addf %29, %28 : vector<8x128xf32>
    %31 = arith.mulf %25, %30 : vector<8x128xf32>
    %c0_14 = arith.constant 0 : index
    %c0_15 = arith.constant 0 : index
    %32 = vector.load %arg2[%c0_14, %c0_15] : memref<128x128xf32, #tpu.memory_space<vmem>>, vector<128x128xf32>
    %cst_16 = arith.constant dense<0.000000e+00> : vector<8x128xf32>
    %33 = tpu.matmul %31, %32, %cst_16 {dimension_numbers = #tpu.dot_dimension_numbers<[1], [0], [0], [1], [0, 0, 1, 1], [], []>} : vector<8x128xf32>, vector<128x128xf32>, vector<8x128xf32> -> vector<8x128xf32>
    %c2 = arith.constant 2 : index
    %c0_17 = arith.constant 0 : index
    %34 = vector.load %arg4[%c2, %c0_17] : memref<8x128xf32, #tpu.memory_space<vmem>>, vector<1x128xf32>
    %c3 = arith.constant 3 : index
    %c0_18 = arith.constant 0 : index
    %35 = vector.load %arg4[%c3, %c0_18] : memref<8x128xf32, #tpu.memory_space<vmem>>, vector<1x128xf32>
    %cst_19 = arith.constant dense<0.000000e+00> : vector<128xf32>
    %36 = vector.multi_reduction <add>, %33, %cst_19 [0] : vector<8x128xf32> to vector<128xf32>
    %37 = vector.shape_cast %36 : vector<128xf32> to vector<1x128xf32>
    %cst_20 = arith.constant 1.250000e-01 : f32
    %38 = vector.broadcast %cst_20 : f32 to vector<1x128xf32>
    %39 = arith.mulf %37, %38 : vector<1x128xf32>
    %40 = vector.broadcast %39 : vector<1x128xf32> to vector<8x128xf32>
    %41 = arith.subf %33, %40 : vector<8x128xf32>
    %42 = arith.mulf %41, %41 : vector<8x128xf32>
    %cst_21 = arith.constant dense<0.000000e+00> : vector<128xf32>
    %43 = vector.multi_reduction <add>, %42, %cst_21 [0] : vector<8x128xf32> to vector<128xf32>
    %44 = vector.shape_cast %43 : vector<128xf32> to vector<1x128xf32>
    %cst_22 = arith.constant 1.250000e-01 : f32
    %45 = vector.broadcast %cst_22 : f32 to vector<1x128xf32>
    %46 = arith.mulf %44, %45 : vector<1x128xf32>
    %cst_23 = arith.constant 9.99999974E-6 : f32
    %47 = vector.broadcast %cst_23 : f32 to vector<1x128xf32>
    %48 = arith.addf %46, %47 : vector<1x128xf32>
    %49 = math.rsqrt %48 : vector<1x128xf32>
    %50 = arith.mulf %34, %49 : vector<1x128xf32>
    %51 = vector.broadcast %50 : vector<1x128xf32> to vector<8x128xf32>
    %52 = arith.mulf %41, %51 : vector<8x128xf32>
    %53 = vector.broadcast %35 : vector<1x128xf32> to vector<8x128xf32>
    %54 = arith.addf %52, %53 : vector<8x128xf32>
    %cst_24 = arith.constant 5.000000e-01 : f32
    %55 = vector.broadcast %cst_24 : f32 to vector<8x128xf32>
    %56 = arith.mulf %55, %54 : vector<8x128xf32>
    %cst_25 = arith.constant 0.707106769 : f32
    %57 = vector.broadcast %cst_25 : f32 to vector<8x128xf32>
    %58 = arith.mulf %54, %57 : vector<8x128xf32>
    %59 = math.erf %58 : vector<8x128xf32>
    %cst_26 = arith.constant 1.000000e+00 : f32
    %60 = vector.broadcast %cst_26 : f32 to vector<8x128xf32>
    %61 = arith.addf %60, %59 : vector<8x128xf32>
    %62 = arith.mulf %56, %61 : vector<8x128xf32>
    %c0_27 = arith.constant 0 : index
    %c0_28 = arith.constant 0 : index
    %63 = vector.load %arg3[%c0_27, %c0_28] : memref<128x128xf32, #tpu.memory_space<vmem>>, vector<128x128xf32>
    %cst_29 = arith.constant dense<0.000000e+00> : vector<8x128xf32>
    %64 = tpu.matmul %62, %63, %cst_29 {dimension_numbers = #tpu.dot_dimension_numbers<[1], [0], [0], [1], [0, 0, 1, 1], [], []>} : vector<8x128xf32>, vector<128x128xf32>, vector<8x128xf32> -> vector<8x128xf32>
    %c4 = arith.constant 4 : index
    %c0_30 = arith.constant 0 : index
    %65 = vector.load %arg4[%c4, %c0_30] : memref<8x128xf32, #tpu.memory_space<vmem>>, vector<1x128xf32>
    %66 = vector.broadcast %65 : vector<1x128xf32> to vector<8x128xf32>
    %67 = arith.addf %64, %66 : vector<8x128xf32>
    %cst_31 = arith.constant 2.000000e+01 : f32
    %68 = vector.broadcast %cst_31 : f32 to vector<8x128xf32>
    %69 = arith.cmpf ogt, %67, %68 : vector<8x128xf32>
    %cst_32 = arith.constant 2.000000e+01 : f32
    %70 = vector.broadcast %cst_32 : f32 to vector<8x128xf32>
    %71 = arith.minimumf %67, %70 : vector<8x128xf32>
    %72 = math.exp %71 : vector<8x128xf32>
    %73 = math.log1p %72 : vector<8x128xf32>
    %74 = arith.select %69, %67, %73 : vector<8x128xi1>, vector<8x128xf32>
    %c5 = arith.constant 5 : index
    %c0_33 = arith.constant 0 : index
    %75 = vector.load %arg4[%c5, %c0_33] : memref<8x128xf32, #tpu.memory_space<vmem>>, vector<1x128xf32>
    %cst_34 = arith.constant 0.000000e+00 : f32
    %76 = vector.broadcast %cst_34 : f32 to vector<1x128xf32>
    %77 = arith.cmpf one, %75, %76 : vector<1x128xf32>
    %78 = vector.shape_cast %77 : vector<1x128xi1> to vector<1x128xi1>
    %79 = vector.broadcast %78 : vector<1x128xi1> to vector<8x128xi1>
    %80 = arith.select %79, %74, %67 : vector<8x128xi1>, vector<8x128xf32>
    %c0_35 = arith.constant 0 : index
    %c0_36 = arith.constant 0 : index
    %81 = vector.load %arg5[%c0_35, %c0_36] : memref<8x128xf32, #tpu.memory_space<vmem>>, vector<8x128xf32>
    tpu.vector_store %arg5[%c0_35, %c0_36], %80 {strides = array<i32>} : memref<8x128xf32, #tpu.memory_space<vmem>>, vector<8x128xf32>,
    return
  }
}

</mosaic_0001>

<bundles_post_ra>
// kernel: tpu_custom_call.1
= control target key start
LH: loop header
LB: loop body
LE: loop exit
PB: predicated region body
PF: predicated region fallthrough
CT: control target
= control target key end

     0   :  { %10 = vsyncpa [#allocation3], 0  ;;  %s844_s0 = inlined_call_operand.hbm [shape: f32[8,32], index: 0, kind: input, shape index: {}]   ;;  %s845_s1 = inlined_call_operand.hbm [shape: f32[32,128], index: 1, kind: input, shape index: {}]   ;;  %s846_s2 = inlined_call_operand.hbm [shape: f32[128,128], index: 2, kind: input, shape index: {}]   ;;  %s847_s3 = inlined_call_operand.hbm [shape: f32[128,128], index: 3, kind: input, shape index: {}]   ;;  %s848_s4 = inlined_call_operand.hbm [shape: f32[8,128], index: 4, kind: input, shape index: {}]   ;;  %s849_s5 = inlined_call_operand.hbm [shape: f32[8,128], index: 5, kind: output, shape index: {}]  }
   0x1   :  { %11 = vsyncpa [#allocation6], 0 }
   0x2   :  { %12 = vsyncpa [#allocation9], 0 }
   0x3   :  { %13 = vsyncpa [#allocation4], 0  ;;  %s729_s18 = smov [#allocation5]  }
   0x4   :  { %s29_s19 = sshll.u32 %s729_s18, 4  ;;  %s30_s19 = int_to_ptr.vmem [resolvable:$true] %s29_s19 }
   0x5   :  { %s609_s20 = scalar_lea.vmem %s30_s19, 512  ;;  %p614_p1 = scmp.lt.s32.totalorder %s30_s19, %s30_s19 }
   0x6   :  { %p610_p0 = scmp.ne.s32.totalorder %s30_s19, %s609_s20  ;;  %p615_p2 = scmp.lt.s32.totalorder %s609_s20, %s609_s20 }
   0x8   :  { %p616_p3 = por %p615_p2, %p614_p1 }
   0xa   :  { %p617_p4 = pnand %p616_p3, %p610_p0 }
   0xc   :  { %620 = shalt.err (!%p617_p4)
}
   0xd   :  { %s730_s21 = smov 128   ;;  %s731_s22 = smov 8  }
   0xe   :  { %35 = dma.hbm_to_vmem [thread:$0]  %s845_s1, 512, %s30_s19, [#allocation6], %s730_s21, %s730_s21, %s731_s22  }
   0xf   :  { %s732_s25 = smov [#allocation8]   ;;  %s733_s27 = smov [#allocation2]  }
  0x10   :  { %s53_s26 = sshll.u32 %s732_s25, 4  ;;  %s20_s28 = sshll.u32 %s733_s27, 4  ;;  %s54_s26 = int_to_ptr.vmem [resolvable:$true] %s53_s26  ;;  %s21_s28 = int_to_ptr.vmem [resolvable:$true] %s20_s28 }
  0x11   :  { %s629_s29 = scalar_lea.vmem %s54_s26, 2048  ;;  %p634_p6 = scmp.lt.s32.totalorder %s54_s26, %s54_s26 }
  0x12   :  { %p630_p5 = scmp.ne.s32.totalorder %s54_s26, %s629_s29  ;;  %p635_p7 = scmp.lt.s32.totalorder %s629_s29, %s629_s29 }
  0x14   :  { %p636_p8 = por %p635_p7, %p634_p6 }
  0x16   :  { %p637_p9 = pnand %p636_p8, %p630_p5 }
  0x18   :  { %640 = shalt.err (!%p637_p9)
}
  0x19   :  { %59 = dma.hbm_to_vmem [thread:$0]  %s847_s3, 2048, %s54_s26, [#allocation9], %s730_s21, %s730_s21, %s731_s22  }
  0x1a   :  { %s649_s1 = scalar_lea.vmem %s21_s28, 128  ;;  %p654_p11 = scmp.lt.s32.totalorder %s21_s28, %s21_s28 }
  0x1b   :  { %p650_p10 = scmp.ne.s32.totalorder %s21_s28, %s649_s1  ;;  %p655_p12 = scmp.lt.s32.totalorder %s649_s1, %s649_s1 }
  0x1d   :  { %p656_p13 = por %p655_p12, %p654_p11 }
  0x1f   :  { %p657_p0 = pnand %p656_p13, %p650_p10 }
  0x21   :  { %660 = shalt.err (!%p657_p0)
}
  0x22   :  { %23 = dma.hbm_to_vmem [thread:$0]  %s844_s0, 128, %s21_s28, [#allocation3]  }
  0x23   :  { %s734_s9 = smov [#allocation7]   ;;  %s735_s11 = smov [#allocation10]  }
  0x24   :  { %s41_s10 = sshll.u32 %s734_s9, 4  ;;  %s66_s12 = sshll.u32 %s735_s11, 4  ;;  %s42_s10 = int_to_ptr.vmem [resolvable:$true] %s41_s10  ;;  %s67_s12 = int_to_ptr.vmem [resolvable:$true] %s66_s12 }
  0x25   :  { %s669_s13 = scalar_lea.vmem %s42_s10, 2048  ;;  %p674_p2 = scmp.lt.s32.totalorder %s42_s10, %s42_s10 }
  0x26   :  { %p670_p1 = scmp.ne.s32.totalorder %s42_s10, %s669_s13  ;;  %p675_p3 = scmp.lt.s32.totalorder %s669_s13, %s669_s13 }
  0x28   :  { %p676_p4 = por %p675_p3, %p674_p2 }
  0x2a   :  { %p677_p5 = pnand %p676_p4, %p670_p1 }
  0x2c   :  { %680 = shalt.err (!%p677_p5)
}
  0x2d   :  { %47 = dma.hbm_to_vmem [thread:$0]  %s846_s2, 2048, %s42_s10, [#allocation6], %s730_s21, %s730_s21, %s731_s22  }
  0x2e   :  { %s689_s0 = scalar_lea.vmem %s67_s12, 128  ;;  %p694_p7 = scmp.lt.s32.totalorder %s67_s12, %s67_s12 }
  0x2f   :  { %p690_p6 = scmp.ne.s32.totalorder %s67_s12, %s689_s0  ;;  %p695_p8 = scmp.lt.s32.totalorder %s689_s0, %s689_s0 }
  0x31   :  { %p696_p9 = por %p695_p8, %p694_p7 }
  0x33   :  { %p697_p10 = pnand %p696_p9, %p690_p6 }
  0x35   :  { %700 = shalt.err (!%p697_p10)
}
  0x36   :  { %69 = dma.hbm_to_vmem [thread:$0]  %s848_s4, 128, %s67_s12, [#allocation9]  }
  0x37   :  { %721 = dma.done.wait [#allocation3], 128  }
  0x38   :  { %722 = vsyncadd [#allocation3], 4294967168 }
  0x39   :  { %723 = dma.done.wait [#allocation6], 2560  }
  0x3a   :  { %724 = vsyncadd [#allocation6], 4294964736 }
  0x3b   :  { %725 = dma.done.wait [#allocation9], 2176  }
  0x3c   :  { %726 = vsyncadd [#allocation9], 4294965120  ;;  %v736_v0 = vmov 0.0   ;;  %vm737_vm0 = vmmov 0   ;;  %v89_v1 = vld [vmem:[#allocation5 + $0x18] sm:$0xff]  ;;  %v88_v2 = vld [vmem:[#allocation5 + $0x10] sm:$0xff]  ;;  %v185_v41 = vlaneseq }
  0x3d   :  { %497 = vmatprep.subr.mxu0 %v736_v0  ;;  %505 = vmatprep.mubr.msk.f32.mxu0 %vm737_vm0, %v736_v0  ;;  %v87_v3 = vld [vmem:[#allocation5 + $0x8] sm:$0xff]  ;;  %v86_v4 = vld [vmem:[#allocation5] sm:$0xff]  ;;  %v85_v5 = vld [vmem:[#allocation2] sm:$0xff]  ;;  %vm90_vm1 = vcmask 261120   ;;  %s739_s2 = smov [#allocation11]  }
  0x3e   :  { %508 = vmatprep.subr.mxu1 %v736_v0  ;;  %540 = vmatprep.mubr.msk.f32.mxu1 %vm737_vm0, %v736_v0  ;;  %v215_v6 = vld [vmem:[#allocation7 + $0x78] sm:$0xff]  ;;  %v214_v7 = vld [vmem:[#allocation7 + $0x70] sm:$0xff]  ;;  %v213_v8 = vld [vmem:[#allocation7 + $0x68] sm:$0xff]  ;;  %v186_v42 = vshrl.u32 %v185_v41, 7  ;;  %s443_s4 = sshll.u32 %s739_s2, 4  ;;  %s444_s4 = int_to_ptr.vmem [resolvable:$true] %s443_s4 }
  0x3f   :  { %498 = vmatpush3.msra.mxu0 %v89_v1  ;;  %509 = vmatpush3.msra.mxu1 %v215_v6  ;;  %v212_v9 = vld [vmem:[#allocation7 + $0x60] sm:$0xff]  ;;  %v211_v10 = vld [vmem:[#allocation7 + $0x58] sm:$0xff]  ;;  %v210_v11 = vld [vmem:[#allocation7 + $0x50] sm:$0xff]  ;;  %s701_s17 = scalar_lea.vmem %s444_s4, 128  ;;  %p706_p12 = scmp.lt.s32.totalorder %s444_s4, %s444_s4 }
  0x40   :  { %499 = vmatprep.subr.mxu0 %v736_v0  ;;  %510 = vmatprep.subr.mxu1 %v736_v0  ;;  %v209_v12 = vld [vmem:[#allocation7 + $0x48] sm:$0xff]  ;;  %v208_v13 = vld [vmem:[#allocation7 + $0x40] sm:$0xff]  ;;  %v207_v14 = vld [vmem:[#allocation7 + $0x38] sm:$0xff]  ;;  %v821_v44 = vsub.s32 0, %v186_v42  ;;  %p702_p11 = scmp.ne.s32.totalorder %s444_s4, %s701_s17  ;;  %p707_p13 = scmp.lt.s32.totalorder %s701_s17, %s701_s17 }
  0x41   :  { %500 = vmatpush3.msra.mxu0 %v88_v2  ;;  %511 = vmatpush3.msra.mxu1 %v214_v7  ;;  %v206_v15 = vld [vmem:[#allocation7 + $0x30] sm:$0xff]  ;;  %v205_v16 = vld [vmem:[#allocation7 + $0x28] sm:$0xff]  ;;  %v204_v17 = vld [vmem:[#allocation7 + $0x20] sm:$0xff] }
  0x42   :  { %501 = vmatprep.subr.mxu0 %v736_v0  ;;  %512 = vmatprep.subr.mxu1 %v736_v0  ;;  %v203_v18 = vld [vmem:[#allocation7 + $0x18] sm:$0xff]  ;;  %v202_v19 = vld [vmem:[#allocation7 + $0x10] sm:$0xff]  ;;  %v201_v20 = vld [vmem:[#allocation7 + $0x8] sm:$0xff]  ;;  %p708_p0 = por %p707_p13, %p706_p12 }
  0x43   :  { %502 = vmatpush3.msra.mxu0 %v87_v3  ;;  %513 = vmatpush3.msra.mxu1 %v213_v8  ;;  %v200_v21 = vld [vmem:[#allocation7] sm:$0xff]  ;;  %v337_v56 = vld [vmem:[#allocation8 + $0x78] sm:$0xff]  ;;  %v336_v57 = vld [vmem:[#allocation8 + $0x70] sm:$0xff] }
  0x44   :  { %503 = vmatprep.subr.mxu0 %v736_v0  ;;  %514 = vmatprep.subr.mxu1 %v736_v0  ;;  %v164_v43 = vld [vmem:[#allocation10] sm:$0x1]  ;;  %v455_v48 = vld [vmem:[#allocation10 + $0x1] ss:$0 sm:$0xff]  ;;  %v335_v58 = vld [vmem:[#allocation8 + $0x68] sm:$0xff]  ;;  %p709_p1 = pnand %p708_p0, %p702_p11 }
  0x45   :  { %504 = vmatpush3.msra.mxu0 %v86_v4  ;;  %515 = vmatpush3.msra.mxu1 %v212_v9  ;;  %v334_v59 = vld [vmem:[#allocation8 + $0x60] sm:$0xff]  ;;  %v333_v60 = vld [vmem:[#allocation8 + $0x58] sm:$0xff]  ;;  %v332_v61 = vld [vmem:[#allocation8 + $0x50] sm:$0xff] }
  0x46   :  { %506 = vmatmul.mubr.msk.f32.vlgmr.msra.gmra.mxu0 %vm90_vm1, %v85_v5  ;;  %543 = vmatprep.subr.mxu0 %v736_v0  ;;  %v331_v62 = vld [vmem:[#allocation8 + $0x48] sm:$0xff]  ;;  %v330_v63 = vld [vmem:[#allocation8 + $0x40] sm:$0xff]  ;;  %v329_v1 = vld [vmem:[#allocation8 + $0x38] sm:$0xff] }
  0x47   :  { %575 = vmatprep.mubr.msk.f32.mxu0 %vm737_vm0, %v736_v0  ;;  %516 = vmatprep.subr.mxu1 %v736_v0  ;;  %v328_v2 = vld [vmem:[#allocation8 + $0x30] sm:$0xff]  ;;  %v327_v3 = vld [vmem:[#allocation8 + $0x28] sm:$0xff]  ;;  %v326_v4 = vld [vmem:[#allocation8 + $0x20] sm:$0xff] }
  0x48   :  { %517 = vmatpush3.msra.mxu1 %v211_v10  ;;  %544 = vmatpush3.msra.mxu0 %v337_v56  ;;  %v325_v5 = vld [vmem:[#allocation8 + $0x18] sm:$0xff]  ;;  %v324_v6 = vld [vmem:[#allocation8 + $0x10] sm:$0xff]  ;;  %v323_v7 = vld [vmem:[#allocation8 + $0x8] sm:$0xff] }
  0x49   :  { %518 = vmatprep.subr.mxu1 %v736_v0  ;;  %545 = vmatprep.subr.mxu0 %v736_v0  ;;  %v322_v8 = vld [vmem:[#allocation8] sm:$0xff] }
  0x4a   :  { %519 = vmatpush3.msra.mxu1 %v210_v11  ;;  %546 = vmatpush3.msra.mxu0 %v336_v57 }
  0x4b   :  { %520 = vmatprep.subr.mxu1 %v736_v0  ;;  %547 = vmatprep.subr.mxu0 %v736_v0 }
  0x4c   :  { %521 = vmatpush3.msra.mxu1 %v209_v12  ;;  %548 = vmatpush3.msra.mxu0 %v335_v58 }
  0x4d   :  { %522 = vmatprep.subr.mxu1 %v736_v0  ;;  %549 = vmatprep.subr.mxu0 %v736_v0 }
  0x4e   :  { %523 = vmatpush3.msra.mxu1 %v208_v13  ;;  %550 = vmatpush3.msra.mxu0 %v334_v59 }
  0x4f   :  { %524 = vmatprep.subr.mxu1 %v736_v0  ;;  %551 = vmatprep.subr.mxu0 %v736_v0 }
  0x50   :  { %525 = vmatpush3.msra.mxu1 %v207_v14  ;;  %552 = vmatpush3.msra.mxu0 %v333_v60 }
  0x51   :  { %526 = vmatprep.subr.mxu1 %v736_v0  ;;  %553 = vmatprep.subr.mxu0 %v736_v0 }
  0x52   :  { %527 = vmatpush3.msra.mxu1 %v206_v15  ;;  %554 = vmatpush3.msra.mxu0 %v332_v61 }
  0x53   :  { %528 = vmatprep.subr.mxu1 %v736_v0  ;;  %555 = vmatprep.subr.mxu0 %v736_v0 }
  0x54   :  { %529 = vmatpush3.msra.mxu1 %v205_v16  ;;  %556 = vmatpush3.msra.mxu0 %v331_v62 }
  0x55   :  { %530 = vmatprep.subr.mxu1 %v736_v0  ;;  %557 = vmatprep.subr.mxu0 %v736_v0 }
  0x56   :  { %531 = vmatpush3.msra.mxu1 %v204_v17  ;;  %558 = vmatpush3.msra.mxu0 %v330_v63 }
  0x57   :  { %532 = vmatprep.subr.mxu1 %v736_v0  ;;  %559 = vmatprep.subr.mxu0 %v736_v0 }
  0x58   :  { %533 = vmatpush3.msra.mxu1 %v203_v18  ;;  %560 = vmatpush3.msra.mxu0 %v329_v1 }
  0x59   :  { %534 = vmatprep.subr.mxu1 %v736_v0  ;;  %561 = vmatprep.subr.mxu0 %v736_v0 }
  0x5a   :  { %535 = vmatpush3.msra.mxu1 %v202_v19  ;;  %562 = vmatpush3.msra.mxu0 %v328_v2 }
  0x5b   :  { %536 = vmatprep.subr.mxu1 %v736_v0  ;;  %563 = vmatprep.subr.mxu0 %v736_v0 }
  0x5c   :  { %537 = vmatpush3.msra.mxu1 %v201_v20  ;;  %564 = vmatpush3.msra.mxu0 %v327_v3 }
  0x5d   :  { %538 = vmatprep.subr.mxu1 %v736_v0  ;;  %565 = vmatprep.subr.mxu0 %v736_v0 }
  0x5e   :  { %539 = vmatpush3.msra.mxu1 %v200_v21  ;;  %566 = vmatpush3.msra.mxu0 %v326_v4 }
  0x5f   :  { %567 = vmatprep.subr.mxu0 %v736_v0 }
  0x60   :  { %568 = vmatpush3.msra.mxu0 %v325_v5 }
  0x61   :  { %569 = vmatprep.subr.mxu0 %v736_v0 }
  0x62   :  { %570 = vmatpush3.msra.mxu0 %v324_v6 }
  0x63   :  { %571 = vmatprep.subr.mxu0 %v736_v0 }
  0x64   :  { %572 = vmatpush3.msra.mxu0 %v323_v7 }
  0x65   :  { %573 = vmatprep.subr.mxu0 %v736_v0 }
  0x66   :  { %574 = vmatpush3.msra.mxu0 %v322_v8 }
 0x106   :  { %v160_v22 = vpop.f32.mrf.mxu0 }
 0x107   :  { %v166_v23 = vrot.slane %v160_v22, 4 }
 0x108   :  { %v507_v24 = vpop.f32.mrf.mxu0 }
 0x109   :  { %v167_v25 = vadd.f32 %v166_v23, %v160_v22 }
 0x10b   :  { %v168_v26 = vrot.slane %v167_v25, 2 }
 0x10d   :  { %v169_v27 = vadd.f32 %v168_v26, %v167_v25 }
 0x10f   :  { %v170_v28 = vrot.slane %v169_v27, 1 }
 0x111   :  { %v171_v29 = vadd.f32 %v170_v28, %v169_v27  ;;  %v286_v27 = vld [vmem:[#allocation10 + $0x2] sm:$0x1] }
 0x113   :  { %v172_v30 = vmul.f32 0.125, %v171_v29 }
 0x115   :  { %v173_v31 = vsub.f32 %v160_v22, %v172_v30 }
 0x117   :  { %v174_v32 = vmul.f32 %v173_v31, %v173_v31 }
 0x119   :  { %v175_v33 = vrot.slane %v174_v32, 4 }
 0x11b   :  { %v176_v34 = vadd.f32 %v175_v33, %v174_v32 }
 0x11d   :  { %v177_v35 = vrot.slane %v176_v34, 2 }
 0x11f   :  { %v178_v36 = vadd.f32 %v177_v35, %v176_v34 }
 0x121   :  { %v179_v37 = vrot.slane %v178_v36, 1 }
 0x123   :  { %v180_v38 = vadd.f32 %v179_v37, %v178_v36 }
 0x125   :  { %v181_v39 = vmul.f32 0.125, %v180_v38 }
 0x127   :  { %v182_v40 = vadd.f32 1e-05, %v181_v39  ;;  %v457_v39 = vld [vmem:[#allocation10 + $0x4] ss:$0 sm:$0xff] }
 0x129   :  { %589 = vrsqrt.f32 %v182_v40 }
 0x136   :  { %v590_v45 = vpop.eup %589 }
 0x137   :  { %v184_v46 = vmul.f32 %v590_v45, %v164_v43 }
 0x139   :  { %v188_v47 = vrot.slane %v184_v46, %v821_v44 }
 0x13b   :  { %v189_v49 = vmul.f32 %v188_v47, %v173_v31  ;;  %v456_v31 = vld [vmem:[#allocation10 + $0x3] ss:$0 sm:$0xff] }
 0x13d   :  { %v194_v50 = vadd.f32 %v455_v48, %v189_v49  ;;  %v427_v48 = vld [vmem:[#allocation10 + $0x5] sm:$0x1] }
 0x13e   :  { %vm428_vm2 = vcmp.ne.f32.partialorder %v427_v48, 0.0 }
 0x13f   :  { %v196_v51 = vmul.f32 0.70710677, %v194_v50  ;;  %v195_v53 = vmul.f32 0.5, %v194_v50  ;;  %v738_v50 = vmov 0  }
 0x141   :  { %591 = verf.f32 %v196_v51  ;;  %v429_v51 = vsel %vm428_vm2, 1, %v738_v50 }
 0x14e   :  { %v592_v52 = vpop.eup %591 }
 0x14f   :  { %v198_v54 = vadd.f32 1.0, %v592_v52 }
 0x151   :  { %v199_v55 = vmul.f32 %v198_v54, %v195_v53  ;;  %v433_v54 = vrot.slane %v429_v51, %v821_v44 }
 0x153   :  { %541 = vmatmul.mubr.f32.vlgmr.msra.gmra.mxu1 %v199_v55  ;;  %vm434_vm4 = vcmp.eq.s32.totalorder %v433_v54, 1 }
 0x213   :  { %v282_v9 = vpop.f32.mrf.mxu1 }
 0x214   :  { %v288_v10 = vrot.slane %v282_v9, 4 }
 0x215   :  { %v542_v11 = vpop.f32.mrf.mxu1 }
 0x216   :  { %v289_v12 = vadd.f32 %v288_v10, %v282_v9 }
 0x218   :  { %v290_v13 = vrot.slane %v289_v12, 2 }
 0x21a   :  { %v291_v14 = vadd.f32 %v290_v13, %v289_v12 }
 0x21c   :  { %v292_v15 = vrot.slane %v291_v14, 1 }
 0x21e   :  { %v293_v16 = vadd.f32 %v292_v15, %v291_v14 }
 0x220   :  { %v294_v17 = vmul.f32 0.125, %v293_v16 }
 0x222   :  { %v295_v18 = vsub.f32 %v282_v9, %v294_v17 }
 0x224   :  { %v296_v19 = vmul.f32 %v295_v18, %v295_v18 }
 0x226   :  { %v297_v20 = vrot.slane %v296_v19, 4 }
 0x228   :  { %v298_v21 = vadd.f32 %v297_v20, %v296_v19 }
 0x22a   :  { %v299_v22 = vrot.slane %v298_v21, 2 }
 0x22c   :  { %v300_v23 = vadd.f32 %v299_v22, %v298_v21 }
 0x22e   :  { %v301_v24 = vrot.slane %v300_v23, 1 }
 0x230   :  { %v302_v25 = vadd.f32 %v301_v24, %v300_v23 }
 0x232   :  { %v303_v26 = vmul.f32 0.125, %v302_v25 }
 0x234   :  { %v304_v0 = vadd.f32 1e-05, %v303_v26 }
 0x236   :  { %593 = vrsqrt.f32 %v304_v0 }
 0x243   :  { %v594_v28 = vpop.eup %593 }
 0x244   :  { %v306_v29 = vmul.f32 %v594_v28, %v286_v27 }
 0x246   :  { %v310_v30 = vrot.slane %v306_v29, %v821_v44 }
 0x248   :  { %v311_v32 = vmul.f32 %v310_v30, %v295_v18 }
 0x24a   :  { %v316_v33 = vadd.f32 %v456_v31, %v311_v32 }
 0x24c   :  { %v318_v34 = vmul.f32 0.70710677, %v316_v33  ;;  %v317_v36 = vmul.f32 0.5, %v316_v33 }
 0x24e   :  { %595 = verf.f32 %v318_v34 }
 0x25b   :  { %v596_v35 = vpop.eup %595 }
 0x25c   :  { %v320_v37 = vadd.f32 1.0, %v596_v35 }
 0x25e   :  { %v321_v38 = vmul.f32 %v320_v37, %v317_v36 }
 0x260   :  { %576 = vmatmul.mubr.f32.vlgmr.msra.gmra.mxu0 %v321_v38 }
 0x320   :  { %v409_v40 = vpop.f32.mrf.mxu0 }
 0x321   :  { %v410_v41 = vadd.f32 %v457_v39, %v409_v40 }
 0x322   :  { %v577_v42 = vpop.f32.mrf.mxu0 }
 0x323   :  { %v414_v43 = vmin.f32 %v410_v41, 20.0  ;;  %vm413_vm5 = vcmp.gt.f32.partialorder %v410_v41, 20.0 }
 0x325   :  { %v415_v45 = vmul.f32 1.442695, %v414_v43 }
 0x327   :  { %597 = vpow2.f32 %v415_v45 }
 0x334   :  { %v598_v46 = vpop.eup %597 }
 0x335   :  { %v417_v47 = vadd.f32 1.0, %v598_v46  ;;  %v420_v49 = vmul.f32 -0.5, %v598_v46  ;;  %v423_v53 = vand.u32 2147483647, %v598_v46 }
 0x337   :  { %599 = vlog2.f32 %v417_v47  ;;  %v421_v52 = vadd.f32 1.0, %v420_v49  ;;  %vm424_vm3 = vcmp.lt.f32.partialorder %v423_v53, 0.0004427343 }
 0x339   :  { %v422_v57 = vmul.f32 %v598_v46, %v421_v52 }
 0x344   :  { %v600_v55 = vpop.eup %599 }
 0x345   :  { %v419_v56 = vmul.f32 0.6931472, %v600_v55 }
 0x347   :  { %v425_v58 = vsel %vm424_vm3, %v422_v57, %v419_v56 }
 0x348   :  { %v426_v59 = vsel %vm413_vm5, %v410_v41, %v425_v58 }
 0x349   :  { %v435_v60 = vsel %vm434_vm4, %v426_v59, %v410_v41 }
 0x34a   :  { %436 = vst [vmem:[#allocation11] sm:$0xff] %v435_v60 }
 0x34b   :  { %712 = shalt.err (!%p709_p1)
}
 0x34c   :  { %446 = dma.vmem_to_hbm [thread:$0]  %s444_s4, 128, %s849_s5, [#allocation4]  }
 0x34d   :  { %727 = dma.done.wait [#allocation4], 128  }
 0x34e   :  { %728 = vsyncadd [#allocation4], 4294967168 }
 0x34f   :  { %450 = vsyncpa [#allocation3], 1 }
 0x350   :  { %451 = vsyncpa [#allocation6], 1 }
 0x351   :  { %452 = vsyncpa [#allocation9], 1 }
 0x352   :  { %453 = vsyncpa [#allocation4], 1 }

</bundles_post_ra>
